<compile_context>
chip_gen: v6e
topology: v6e:2x2x1
jax: 0.10.0
libtpu: 0.0.40
codegen_flags: <defaults>
</compile_context>

<pallas_src>
import jax
import jax.numpy as jnp
from jax.experimental import pallas as pl
from jax.experimental.pallas import tpu as pltpu

ROW_COUNT = 6
COLUMN_COUNT = 7
HIDDEN_SIZE = 128
INPUT_SIZE = ROW_COUNT * COLUMN_COUNT  # 42
HEAD_WIDTH = 128                       # lane-dense fused policy+value head width


def alphazero_kernel(x_ref,
                     w1_ref, b1_ref,
                     w2_ref, b2_ref,
                     wh_ref, bh_ref,
                     out_ref):
    x = x_ref[...]  # (TB, INPUT_SIZE) bf16

    # fc1 + relu  (bf16 MXU, f32 accumulate, f32 bias)
    h1 = jnp.dot(x, w1_ref[...], preferred_element_type=jnp.float32) + b1_ref[...]
    h1 = jnp.maximum(h1, 0.0).astype(jnp.bfloat16)

    # fc2 + relu
    h2 = jnp.dot(h1, w2_ref[...], preferred_element_type=jnp.float32) + b2_ref[...]
    h2 = jnp.maximum(h2, 0.0).astype(jnp.bfloat16)

    # fused policy+value head: cols [0:7] = policy logits, col 7 = value (pre-tanh)
    head = jnp.dot(h2, wh_ref[...], preferred_element_type=jnp.float32) + bh_ref[...]

    # tanh only on the value lane (EUP slot is otherwise idle); policy lanes pass through.
    lane = jax.lax.broadcasted_iota(jnp.int32, head.shape, dimension=1)
    out_ref[...] = jnp.where(lane == COLUMN_COUNT, jnp.tanh(head), head)


def alphazero_forward(x, params, *, batch_tile=256):
    """x: (B, INPUT_SIZE) float32/bf16.

    Returns (policy_logits (B, COLUMN_COUNT) f32, value (B, 1) f32).
    params = (w1 (42,128) bf16, b1 (1,128) f32,
              w2 (128,128) bf16, b2 (1,128) f32,
              wh (128,128) bf16, bh (1,128) f32)   # fused policy+value head
    """
    w1, b1, w2, b2, wh, bh = params
    B = x.shape[0]

    # Aligned batch tile: >= 8 sublanes, default 256 (multiple of 128 & 256 for MXU fill).
    TB = min(batch_tile, max(8, pl.cdiv(B, 8) * 8))
    B_pad = pl.cdiv(B, TB) * TB
    if B_pad != B:
        x = jnp.pad(x, ((0, B_pad - B), (0, 0)))
    x = x.astype(jnp.bfloat16)

    grid = (B_pad // TB,)

    def resident(shape):
        # Weights/biases: full-array block, constant block index -> stays in VMEM.
        return pl.BlockSpec(shape, lambda i: (0,) * len(shape))

    flops = 2 * B_pad * (INPUT_SIZE * HIDDEN_SIZE
                         + HIDDEN_SIZE * HIDDEN_SIZE
                         + HIDDEN_SIZE * HEAD_WIDTH)
    weight_bytes = 2 * (w1.size + w2.size + wh.size) + 4 * (b1.size + b2.size + bh.size)
    bytes_accessed = B_pad * INPUT_SIZE * 2 + weight_bytes + B_pad * HEAD_WIDTH * 4
    cost = pl.CostEstimate(flops=flops,
                           transcendentals=B_pad * HEAD_WIDTH,
                           bytes_accessed=bytes_accessed)

    out = pl.pallas_call(
        alphazero_kernel,
        out_shape=jax.ShapeDtypeStruct((B_pad, HEAD_WIDTH), jnp.float32),
        grid=grid,
        in_specs=[
            pl.BlockSpec((TB, INPUT_SIZE), lambda i: (i, 0)),
            resident(w1.shape), resident(b1.shape),
            resident(w2.shape), resident(b2.shape),
            resident(wh.shape), resident(bh.shape),
        ],
        out_specs=pl.BlockSpec((TB, HEAD_WIDTH), lambda i: (i, 0)),
        compiler_params=pltpu.CompilerParams(dimension_semantics=("parallel",)),
        cost_estimate=cost,
    )(x, w1, b1, w2, b2, wh, bh)

    policy_logits = out[:B, :COLUMN_COUNT]
    value = out[:B, COLUMN_COUNT:COLUMN_COUNT + 1]
    return policy_logits, value


def init_params(key, rows=ROW_COUNT, cols=COLUMN_COUNT, hidden_size=HIDDEN_SIZE):
    """nn.Linear-style init (uniform +/- 1/sqrt(fan_in)); weights stored as
    (in_features, out_features); policy+value heads packed into one (hidden, 128)
    lane-dense weight (cols 0:7 policy, col 7 value, rest zero)."""
    input_size = rows * cols

    def linear(k, fan_in, fan_out):
        kw, kb = jax.random.split(k)
        bound = 1.0 / jnp.sqrt(fan_in)
        w = jax.random.uniform(kw, (fan_in, fan_out), jnp.float32, -bound, bound)
        b = jax.random.uniform(kb, (1, fan_out), jnp.float32, -bound, bound)
        return w, b

    k1, k2, k3, k4 = jax.random.split(key, 4)
    w1, b1 = linear(k1, input_size, hidden_size)
    w2, b2 = linear(k2, hidden_size, hidden_size)
    wp, bp = linear(k3, hidden_size, cols)
    wv, bv = linear(k4, hidden_size, 1)

    # Fuse heads into a lane-dense (hidden, 128) weight / (1, 128) bias.
    wh = jnp.zeros((hidden_size, HEAD_WIDTH), jnp.float32)
    wh = wh.at[:, :cols].set(wp)
    wh = wh.at[:, cols:cols + 1].set(wv)
    bh = jnp.zeros((1, HEAD_WIDTH), jnp.float32)
    bh = bh.at[:, :cols].set(bp)
    bh = bh.at[:, cols:cols + 1].set(bv)

    # Matmul weights in bf16 (native MXU rate), biases in f32.
    return (w1.astype(jnp.bfloat16), b1,
            w2.astype(jnp.bfloat16), b2,
            wh.astype(jnp.bfloat16), bh)


def reference_forward(x, params):
    """Pure-JAX reference mirroring the kernel's bf16/f32 mixed precision."""
    w1, b1, w2, b2, wh, bh = params
    xb = x.astype(jnp.bfloat16)
    h1 = jnp.maximum(jnp.dot(xb, w1, preferred_element_type=jnp.float32) + b1, 0.0)
    h1 = h1.astype(jnp.bfloat16)
    h2 = jnp.maximum(jnp.dot(h1, w2, preferred_element_type=jnp.float32) + b2, 0.0)
    h2 = h2.astype(jnp.bfloat16)
    head = jnp.dot(h2, wh, preferred_element_type=jnp.float32) + bh
    policy = head[:, :COLUMN_COUNT]
    value = jnp.tanh(head[:, COLUMN_COUNT:COLUMN_COUNT + 1])
    return policy, value


if __name__ == "__main__":
    key = jax.random.PRNGKey(0)
    k_params, k_x = jax.random.split(key)

    params = init_params(k_params)

    batch = 8
    x = jax.random.uniform(k_x, (batch, INPUT_SIZE), jnp.float32, -1.0, 1.0)

    policy_logits, value = alphazero_forward(x, params)
    jax.block_until_ready((policy_logits, value))

    ref_policy, ref_value = reference_forward(x, params)
    assert policy_logits.shape == (batch, COLUMN_COUNT)
    assert value.shape == (batch, 1)
    assert jnp.allclose(policy_logits, ref_policy, atol=1e-3, rtol=1e-3), (
        jnp.max(jnp.abs(policy_logits - ref_policy)))
    assert jnp.allclose(value, ref_value, atol=1e-3, rtol=1e-3), (
        jnp.max(jnp.abs(value - ref_value)))

    print("KERNEL_OK")
</pallas_src>

<mosaic_0001>
module attributes {stable_mosaic.version = 11 : i64} {
  func.func @alphazero_kernel(%arg0: i32, %arg1: memref<8x42xbf16, #tpu.memory_space<vmem>>, %arg2: memref<42x128xbf16, #tpu.memory_space<vmem>>, %arg3: memref<1x128xf32, #tpu.memory_space<vmem>>, %arg4: memref<128x128xbf16, #tpu.memory_space<vmem>>, %arg5: memref<1x128xf32, #tpu.memory_space<vmem>>, %arg6: memref<128x128xbf16, #tpu.memory_space<vmem>>, %arg7: memref<1x128xf32, #tpu.memory_space<vmem>>, %arg8: memref<8x128xf32, #tpu.memory_space<vmem>>) attributes {dimension_semantics = [#tpu.dimension_semantics<parallel>], iteration_bounds = array<i64: 1>, scalar_prefetch = 0 : i64, scratch_operands = 0 : i64, tpu.core_type = #tpu.core_type<tc>, window_params = [{transform_indices = @transform_0, window_bounds = array<i64: 8, 42>}, {pipeline_mode = #tpu.pipeline_mode<synchronous>, transform_indices = @transform_1, window_bounds = array<i64: 42, 128>}, {pipeline_mode = #tpu.pipeline_mode<synchronous>, transform_indices = @transform_2, window_bounds = array<i64: 1, 128>}, {pipeline_mode = #tpu.pipeline_mode<synchronous>, transform_indices = @transform_3, window_bounds = array<i64: 128, 128>}, {pipeline_mode = #tpu.pipeline_mode<synchronous>, transform_indices = @transform_4, window_bounds = array<i64: 1, 128>}, {pipeline_mode = #tpu.pipeline_mode<synchronous>, transform_indices = @transform_5, window_bounds = array<i64: 128, 128>}, {pipeline_mode = #tpu.pipeline_mode<synchronous>, transform_indices = @transform_6, window_bounds = array<i64: 1, 128>}, {transform_indices = @transform_7, window_bounds = array<i64: 8, 128>}]} {
    %c0 = arith.constant 0 : index
    %c0_0 = arith.constant 0 : index
    %0 = vector.load %arg1[%c0, %c0_0] : memref<8x42xbf16, #tpu.memory_space<vmem>>, vector<8x42xbf16>
    %c0_1 = arith.constant 0 : index
    %c0_2 = arith.constant 0 : index
    %1 = vector.load %arg2[%c0_1, %c0_2] : memref<42x128xbf16, #tpu.memory_space<vmem>>, vector<42x128xbf16>
    %cst = arith.constant dense<0.000000e+00> : vector<8x128xf32>
    %2 = tpu.matmul %0, %1, %cst {dimension_numbers = #tpu.dot_dimension_numbers<[1], [0], [0], [1], [0, 0, 1, 1], [], []>} : vector<8x42xbf16>, vector<42x128xbf16>, vector<8x128xf32> -> vector<8x128xf32>
    %c0_3 = arith.constant 0 : index
    %c0_4 = arith.constant 0 : index
    %3 = vector.load %arg3[%c0_3, %c0_4] : memref<1x128xf32, #tpu.memory_space<vmem>>, vector<1x128xf32>
    %4 = vector.broadcast %3 : vector<1x128xf32> to vector<8x128xf32>
    %5 = arith.addf %2, %4 : vector<8x128xf32>
    %cst_5 = arith.constant 0.000000e+00 : f32
    %6 = vector.broadcast %cst_5 : f32 to vector<8x128xf32>
    %7 = arith.maximumf %5, %6 : vector<8x128xf32>
    %8 = arith.truncf %7 : vector<8x128xf32> to vector<8x128xbf16>
    %c0_6 = arith.constant 0 : index
    %c0_7 = arith.constant 0 : index
    %9 = vector.load %arg4[%c0_6, %c0_7] : memref<128x128xbf16, #tpu.memory_space<vmem>>, vector<128x128xbf16>
    %cst_8 = arith.constant dense<0.000000e+00> : vector<8x128xf32>
    %10 = tpu.matmul %8, %9, %cst_8 {dimension_numbers = #tpu.dot_dimension_numbers<[1], [0], [0], [1], [0, 0, 1, 1], [], []>} : vector<8x128xbf16>, vector<128x128xbf16>, vector<8x128xf32> -> vector<8x128xf32>
    %c0_9 = arith.constant 0 : index
    %c0_10 = arith.constant 0 : index
    %11 = vector.load %arg5[%c0_9, %c0_10] : memref<1x128xf32, #tpu.memory_space<vmem>>, vector<1x128xf32>
    %12 = vector.broadcast %11 : vector<1x128xf32> to vector<8x128xf32>
    %13 = arith.addf %10, %12 : vector<8x128xf32>
    %cst_11 = arith.constant 0.000000e+00 : f32
    %14 = vector.broadcast %cst_11 : f32 to vector<8x128xf32>
    %15 = arith.maximumf %13, %14 : vector<8x128xf32>
    %16 = arith.truncf %15 : vector<8x128xf32> to vector<8x128xbf16>
    %c0_12 = arith.constant 0 : index
    %c0_13 = arith.constant 0 : index
    %17 = vector.load %arg6[%c0_12, %c0_13] : memref<128x128xbf16, #tpu.memory_space<vmem>>, vector<128x128xbf16>
    %cst_14 = arith.constant dense<0.000000e+00> : vector<8x128xf32>
    %18 = tpu.matmul %16, %17, %cst_14 {dimension_numbers = #tpu.dot_dimension_numbers<[1], [0], [0], [1], [0, 0, 1, 1], [], []>} : vector<8x128xbf16>, vector<128x128xbf16>, vector<8x128xf32> -> vector<8x128xf32>
    %c0_15 = arith.constant 0 : index
    %c0_16 = arith.constant 0 : index
    %19 = vector.load %arg7[%c0_15, %c0_16] : memref<1x128xf32, #tpu.memory_space<vmem>>, vector<1x128xf32>
    %20 = vector.broadcast %19 : vector<1x128xf32> to vector<8x128xf32>
    %21 = arith.addf %18, %20 : vector<8x128xf32>
    %22 = tpu.iota {dimensions = array<i32: 1>} : vector<8x128xi32>
    %c7_i32 = arith.constant 7 : i32
    %23 = vector.broadcast %c7_i32 : i32 to vector<8x128xi32>
    %24 = arith.cmpi eq, %22, %23 : vector<8x128xi32>
    %25 = math.tanh %21 : vector<8x128xf32>
    %26 = arith.select %24, %25, %21 : vector<8x128xi1>, vector<8x128xf32>
    %c0_17 = arith.constant 0 : index
    %c0_18 = arith.constant 0 : index
    %27 = vector.load %arg8[%c0_17, %c0_18] : memref<8x128xf32, #tpu.memory_space<vmem>>, vector<8x128xf32>
    tpu.vector_store %arg8[%c0_17, %c0_18], %26 {strides = array<i32>} : memref<8x128xf32, #tpu.memory_space<vmem>>, vector<8x128xf32>,
    return
  }
  func.func @transform_0(%arg0: i32) -> (i32, i32) {
    %c0_i32 = arith.constant 0 : i32
    %c0_i32_0 = arith.constant 0 : i32
    return %arg0, %c0_i32 : i32, i32
  }
  func.func @transform_1(%arg0: i32) -> (i32, i32) {
    %c0_i32 = arith.constant 0 : i32
    %c0_i32_0 = arith.constant 0 : i32
    %c0_i32_1 = arith.constant 0 : i32
    return %c0_i32, %c0_i32_0 : i32, i32
  }
  func.func @transform_2(%arg0: i32) -> (i32, i32) {
    %c0_i32 = arith.constant 0 : i32
    %c0_i32_0 = arith.constant 0 : i32
    %c0_i32_1 = arith.constant 0 : i32
    return %c0_i32, %c0_i32_0 : i32, i32
  }
  func.func @transform_3(%arg0: i32) -> (i32, i32) {
    %c0_i32 = arith.constant 0 : i32
    %c0_i32_0 = arith.constant 0 : i32
    %c0_i32_1 = arith.constant 0 : i32
    return %c0_i32, %c0_i32_0 : i32, i32
  }
  func.func @transform_4(%arg0: i32) -> (i32, i32) {
    %c0_i32 = arith.constant 0 : i32
    %c0_i32_0 = arith.constant 0 : i32
    %c0_i32_1 = arith.constant 0 : i32
    return %c0_i32, %c0_i32_0 : i32, i32
  }
  func.func @transform_5(%arg0: i32) -> (i32, i32) {
    %c0_i32 = arith.constant 0 : i32
    %c0_i32_0 = arith.constant 0 : i32
    %c0_i32_1 = arith.constant 0 : i32
    return %c0_i32, %c0_i32_0 : i32, i32
  }
  func.func @transform_6(%arg0: i32) -> (i32, i32) {
    %c0_i32 = arith.constant 0 : i32
    %c0_i32_0 = arith.constant 0 : i32
    %c0_i32_1 = arith.constant 0 : i32
    return %c0_i32, %c0_i32_0 : i32, i32
  }
  func.func @transform_7(%arg0: i32) -> (i32, i32) {
    %c0_i32 = arith.constant 0 : i32
    %c0_i32_0 = arith.constant 0 : i32
    return %arg0, %c0_i32 : i32, i32
  }
}

</mosaic_0001>

<bundles_post_ra>
// kernel: tpu_custom_call.1
= control target key start
LH: loop header
LB: loop body
LE: loop exit
PB: predicated region body
PF: predicated region fallthrough
CT: control target
= control target key end

     0   :  { %12 = vsyncpa [#allocation3], 0  ;;  %s749_s0 = inlined_call_operand.hbm [shape: bf16[8,42], index: 0, kind: input, shape index: {}]   ;;  %s750_s1 = inlined_call_operand.hbm [shape: bf16[42,128], index: 1, kind: input, shape index: {}]   ;;  %s751_s2 = inlined_call_operand.vmem [shape: f32[1,128], index: 2, kind: input, shape index: {}]   ;;  %s752_s3 = inlined_call_operand.hbm [shape: bf16[128,128], index: 3, kind: input, shape index: {}]   ;;  %s753_s4 = inlined_call_operand.vmem [shape: f32[1,128], index: 4, kind: input, shape index: {}]   ;;  %s754_s5 = inlined_call_operand.hbm [shape: bf16[128,128], index: 5, kind: input, shape index: {}]   ;;  %s755_s6 = inlined_call_operand.vmem [shape: f32[1,128], index: 6, kind: input, shape index: {}]   ;;  %s756_s7 = inlined_call_operand.hbm [shape: f32[8,128], index: 7, kind: output, shape index: {}]  }
   0x1   :  { %13 = vsyncpa [#allocation6], 0 }
   0x2   :  { %14 = vsyncpa [#allocation9], 0 }
   0x3   :  { %15 = vsyncpa [#allocation4], 0  ;;  %s642_s24 = smov [#allocation5]  }
   0x4   :  { %s31_s25 = sshll.u32 %s642_s24, 4  ;;  %s32_s25 = int_to_ptr.vmem [resolvable:$true] %s31_s25 }
   0x5   :  { %s542_s26 = scalar_lea.vmem %s32_s25, 384  ;;  %p547_p1 = scmp.lt.s32.totalorder %s32_s25, %s32_s25 }
   0x6   :  { %p543_p0 = scmp.ne.s32.totalorder %s32_s25, %s542_s26  ;;  %p548_p2 = scmp.lt.s32.totalorder %s542_s26, %s542_s26 }
   0x8   :  { %p549_p3 = por %p548_p2, %p547_p1 }
   0xa   :  { %p550_p4 = pnand %p549_p3, %p543_p0 }
   0xc   :  { %553 = shalt.err (!%p550_p4)
}
   0xd   :  { %s643_s27 = smov 64   ;;  %s644_s28 = smov 4  }
   0xe   :  { %37 = dma.hbm_to_vmem [thread:$0]  %s750_s1, 384, %s32_s25, [#allocation6], %s643_s27, %s643_s27, %s644_s28  }
   0xf   :  { %s645_s8 = smov [#allocation2]   ;;  %s646_s10 = smov [#allocation7]  }
  0x10   :  { %s22_s9 = sshll.u32 %s645_s8, 4  ;;  %s45_s11 = sshll.u32 %s646_s10, 4  ;;  %s23_s9 = int_to_ptr.vmem [resolvable:$true] %s22_s9  ;;  %s46_s11 = int_to_ptr.vmem [resolvable:$true] %s45_s11 }
  0x11   :  { %s562_s12 = scalar_lea.vmem %s23_s9, 64  ;;  %p567_p6 = scmp.lt.s32.totalorder %s23_s9, %s23_s9 }
  0x12   :  { %p563_p5 = scmp.ne.s32.totalorder %s23_s9, %s562_s12  ;;  %p568_p7 = scmp.lt.s32.totalorder %s562_s12, %s562_s12 }
  0x14   :  { %p569_p8 = por %p568_p7, %p567_p6 }
  0x16   :  { %p570_p9 = pnand %p569_p8, %p563_p5 }
  0x18   :  { %573 = shalt.err (!%p570_p9)
}
  0x19   :  { %25 = dma.hbm_to_vmem [thread:$0]  %s749_s0, 64, %s23_s9, [#allocation3]  }
  0x1a   :  { %s582_s15 = scalar_lea.vmem %s46_s11, 1024  ;;  %p587_p11 = scmp.lt.s32.totalorder %s46_s11, %s46_s11 }
  0x1b   :  { %p583_p10 = scmp.ne.s32.totalorder %s46_s11, %s582_s15  ;;  %p588_p12 = scmp.lt.s32.totalorder %s582_s15, %s582_s15 }
  0x1d   :  { %p589_p13 = por %p588_p12, %p587_p11 }
  0x1f   :  { %p590_p0 = pnand %p589_p13, %p583_p10 }
  0x21   :  { %593 = shalt.err (!%p590_p0)
}
  0x22   :  { %51 = dma.hbm_to_vmem [thread:$0]  %s752_s3, 1024, %s46_s11, [#allocation6], %s643_s27, %s643_s27, %s644_s28  }
  0x23   :  { %s647_s17 = smov [#allocation8]  }
  0x24   :  { %s59_s18 = sshll.u32 %s647_s17, 4  ;;  %s60_s18 = int_to_ptr.vmem [resolvable:$true] %s59_s18 }
  0x25   :  { %s602_s19 = scalar_lea.vmem %s60_s18, 1024  ;;  %p607_p2 = scmp.lt.s32.totalorder %s60_s18, %s60_s18 }
  0x26   :  { %p603_p1 = scmp.ne.s32.totalorder %s60_s18, %s602_s19  ;;  %p608_p3 = scmp.lt.s32.totalorder %s602_s19, %s602_s19 }
  0x28   :  { %p609_p4 = por %p608_p3, %p607_p2 }
  0x2a   :  { %p610_p5 = pnand %p609_p4, %p603_p1 }
  0x2c   :  { %613 = shalt.err (!%p610_p5)
}
  0x2d   :  { %65 = dma.hbm_to_vmem [thread:$0]  %s754_s5, 1024, %s60_s18, [#allocation9], %s643_s27, %s643_s27, %s644_s28  }
  0x2e   :  { %634 = dma.done.wait [#allocation3], 64  }
  0x2f   :  { %635 = vsyncadd [#allocation3], 4294967232 }
  0x30   :  { %636 = dma.done.wait [#allocation6], 1408  }
  0x31   :  { %637 = vsyncadd [#allocation6], 4294965888 }
  0x32   :  { %638 = dma.done.wait [#allocation9], 1024  }
  0x33   :  { %639 = vsyncadd [#allocation9], 4294966272  ;;  %v648_v0 = vmov 0.0   ;;  %vm649_vm0 = vmmov 0   ;;  %vm116_vm1 = vcmask 1044480   ;;  %v514_v3 = vld [vmem:[#allocation5 + $0x8] sm:$0xff]   ;;  %v386_v44 = vlaneseq }
  0x34   :  { %454 = vmatprep.subr.bf16.mxu0 %v648_v0  ;;  %460 = vmatprep.mubr.msk.bf16.mxu0 %vm649_vm0, %v648_v0  ;;  %v513_v1 = vld [vmem:[#allocation5 + $0x10] sm:$0x1f]   ;;  %v517_v5 = vld [vmem:[#allocation7 + $0x30] sm:$0xff]   ;;  %v515_v6 = vld [vmem:[#allocation5] sm:$0xff]   ;;  %vm112_vm2 = vcmask 343040  }
  0x35   :  { %464 = vmatprep.subr.bf16.mxu1 %v648_v0  ;;  %480 = vmatprep.mubr.msk.bf16.mxu1 %vm649_vm0, %v648_v0  ;;  %v118_v2 = vsel %vm116_vm1, %v513_v1, 0  ;;  %v516_v4 = vld [vmem:[#allocation7 + $0x38] sm:$0xff]   ;;  %v81_v7 = vld [vmem:[#allocation2] sm:$0xf]  ;;  %v518_v8 = vld [vmem:[#allocation7 + $0x28] sm:$0xff]   ;;  %v387_v45 = vand.u32 127, %v386_v44 }
  0x36   :  { %455 = vmatpush3.bf16.msra.mxu0 %v118_v2  ;;  %465 = vmatpush3.bf16.msra.mxu1 %v516_v4  ;;  %v519_v9 = vld [vmem:[#allocation7 + $0x20] sm:$0xff]   ;;  %v520_v10 = vld [vmem:[#allocation7 + $0x18] sm:$0xff]   ;;  %v521_v11 = vld [vmem:[#allocation7 + $0x10] sm:$0xff]  }
  0x37   :  { %456 = vmatprep.subr.bf16.mxu0 %v648_v0  ;;  %466 = vmatprep.subr.bf16.mxu1 %v648_v0  ;;  %v522_v12 = vld [vmem:[#allocation7 + $0x8] sm:$0xff]   ;;  %v523_v13 = vld [vmem:[#allocation7] sm:$0xff]   ;;  %v524_v14 = vld [vmem:[#allocation8 + $0x38] sm:$0xff]   ;;  %vm388_vm3 = vcmp.eq.s32.totalorder %v387_v45, 7 }
  0x38   :  { %v525_v15 = vld [vmem:[#allocation8 + $0x30] sm:$0xff]   ;;  %v526_v16 = vld [vmem:[#allocation8 + $0x28] sm:$0xff]   ;;  %v527_v17 = vld [vmem:[#allocation8 + $0x20] sm:$0xff]  }
  0x39   :  { %v528_v18 = vld [vmem:[#allocation8 + $0x18] sm:$0xff]   ;;  %v529_v19 = vld [vmem:[#allocation8 + $0x10] sm:$0xff]   ;;  %v409_v20 = vld [vmem:[%s751_s2] ss:$0 sm:$0xff] }
  0x3a   :  { %457 = vmatpush3.bf16.msra.mxu0 %v514_v3  ;;  %467 = vmatpush3.bf16.msra.mxu1 %v517_v5  ;;  %v530_v28 = vld [vmem:[#allocation8 + $0x8] sm:$0xff]   ;;  %v531_v29 = vld [vmem:[#allocation8] sm:$0xff]  }
  0x3b   :  { %458 = vmatprep.subr.bf16.mxu0 %v648_v0  ;;  %468 = vmatprep.subr.bf16.mxu1 %v648_v0  ;;  %v414_v30 = vld [vmem:[%s753_s4] ss:$0 sm:$0xff]  ;;  %s650_s4 = smov [#allocation10]  }
  0x3c   :  { %v423_v38 = vld [vmem:[%s755_s6] ss:$0 sm:$0xff]  ;;  %s398_s24 = sshll.u32 %s650_s4, 4  ;;  %s399_s24 = int_to_ptr.vmem [resolvable:$true] %s398_s24 }
  0x3d   :  { %s614_s25 = scalar_lea.vmem %s399_s24, 128  ;;  %p619_p7 = scmp.lt.s32.totalorder %s399_s24, %s399_s24 }
  0x3e   :  { %459 = vmatpush3.bf16.msra.mxu0 %v515_v6  ;;  %469 = vmatpush3.bf16.msra.mxu1 %v518_v8  ;;  %p615_p6 = scmp.ne.s32.totalorder %s399_s24, %s614_s25  ;;  %p620_p8 = scmp.lt.s32.totalorder %s614_s25, %s614_s25 }
  0x3f   :  { %484 = vmatprep.subr.bf16.mxu0 %v648_v0  ;;  %470 = vmatprep.subr.bf16.mxu1 %v648_v0 }
  0x40   :  { %p621_p9 = por %p620_p8, %p619_p7 }
  0x41   :  { %461 = vmatmul.mubr.msk.bf16.vlgmr.msra.gmra.mxu0 %vm112_vm2, %v81_v7 }
  0x42   :  { %500 = vmatprep.mubr.msk.bf16.mxu0 %vm649_vm0, %v648_v0  ;;  %471 = vmatpush3.bf16.msra.mxu1 %v519_v9  ;;  %p622_p10 = pnand %p621_p9, %p615_p6 }
  0x43   :  { %472 = vmatprep.subr.bf16.mxu1 %v648_v0  ;;  %485 = vmatpush3.bf16.msra.mxu0 %v524_v14 }
  0x44   :  { %486 = vmatprep.subr.bf16.mxu0 %v648_v0 }
  0x46   :  { %473 = vmatpush3.bf16.msra.mxu1 %v520_v10 }
  0x47   :  { %474 = vmatprep.subr.bf16.mxu1 %v648_v0  ;;  %487 = vmatpush3.bf16.msra.mxu0 %v525_v15 }
  0x48   :  { %488 = vmatprep.subr.bf16.mxu0 %v648_v0 }
  0x4a   :  { %475 = vmatpush3.bf16.msra.mxu1 %v521_v11 }
  0x4b   :  { %476 = vmatprep.subr.bf16.mxu1 %v648_v0  ;;  %489 = vmatpush3.bf16.msra.mxu0 %v526_v16 }
  0x4c   :  { %490 = vmatprep.subr.bf16.mxu0 %v648_v0 }
  0x4e   :  { %477 = vmatpush3.bf16.msra.mxu1 %v522_v12 }
  0x4f   :  { %478 = vmatprep.subr.bf16.mxu1 %v648_v0  ;;  %491 = vmatpush3.bf16.msra.mxu0 %v527_v17 }
  0x50   :  { %492 = vmatprep.subr.bf16.mxu0 %v648_v0 }
  0x52   :  { %479 = vmatpush3.bf16.msra.mxu1 %v523_v13 }
  0x53   :  { %493 = vmatpush3.bf16.msra.mxu0 %v528_v18 }
  0x54   :  { %494 = vmatprep.subr.bf16.mxu0 %v648_v0 }
  0x57   :  { %495 = vmatpush3.bf16.msra.mxu0 %v529_v19 }
  0x58   :  { %496 = vmatprep.subr.bf16.mxu0 %v648_v0 }
  0x5b   :  { %497 = vmatpush3.bf16.msra.mxu0 %v530_v28 }
  0x5c   :  { %498 = vmatprep.subr.bf16.mxu0 %v648_v0 }
  0x5f   :  { %499 = vmatpush3.bf16.msra.mxu0 %v531_v29 }
 0x101   :  { %v154_v21 = vpop.f32.mrf.mxu0 }
 0x102   :  { %v155_v22 = vadd.f32 %v409_v20, %v154_v21 }
 0x103   :  { %v462_v23 = vpop.f32.mrf.mxu0 }
 0x104   :  { %v160_v24 = vmax.f32 %v155_v22, 0.0 }
 0x105   :  { %v157_v25 = vpop.f32.mrf.mxu0 }
 0x106   :  { %v161_v26 = vpack.c.bf16 %v160_v24, %v160_v24 }
 0x107   :  { %v463_v27 = vpop.f32.mrf.mxu0 }
 0x108   :  { %481 = vmatmul.mubr.bf16.vlgmr.msra.gmra.mxu1 %v161_v26 }
 0x1c8   :  { %v267_v31 = vpop.f32.mrf.mxu1 }
 0x1c9   :  { %v268_v32 = vadd.f32 %v414_v30, %v267_v31 }
 0x1ca   :  { %v482_v33 = vpop.f32.mrf.mxu1 }
 0x1cb   :  { %v273_v34 = vmax.f32 %v268_v32, 0.0 }
 0x1cc   :  { %v270_v35 = vpop.f32.mrf.mxu1 }
 0x1cd   :  { %v274_v36 = vpack.c.bf16 %v273_v34, %v273_v34 }
 0x1ce   :  { %v483_v37 = vpop.f32.mrf.mxu1 }
 0x1cf   :  { %501 = vmatmul.mubr.bf16.vlgmr.msra.gmra.mxu0 %v274_v36 }
 0x28f   :  { %v380_v39 = vpop.f32.mrf.mxu0 }
 0x290   :  { %v381_v40 = vadd.f32 %v423_v38, %v380_v39 }
 0x291   :  { %v502_v41 = vpop.f32.mrf.mxu0 }
 0x292   :  { %532 = vtanh.f32 %v381_v40 }
 0x293   :  { %v383_v42 = vpop.f32.mrf.mxu0 }
 0x295   :  { %v503_v43 = vpop.f32.mrf.mxu0 }
 0x29f   :  { %v533_v46 = vpop.eup %532 }
 0x2a0   :  { %v390_v47 = vsel %vm388_vm3, %v533_v46, %v381_v40 }
 0x2a1   :  { %391 = vst [vmem:[#allocation10] sm:$0xff] %v390_v47 }
 0x2a2   :  { %625 = shalt.err (!%p622_p10)
}
 0x2a3   :  { %401 = dma.vmem_to_hbm [thread:$0]  %s399_s24, 128, %s756_s7, [#allocation4]  }
 0x2a4   :  { %640 = dma.done.wait [#allocation4], 128  }
 0x2a5   :  { %641 = vsyncadd [#allocation4], 4294967168 }
 0x2a6   :  { %405 = vsyncpa [#allocation3], 1 }
 0x2a7   :  { %406 = vsyncpa [#allocation6], 1 }
 0x2a8   :  { %407 = vsyncpa [#allocation9], 1 }
 0x2a9   :  { %408 = vsyncpa [#allocation4], 1 }

</bundles_post_ra>
